<compile_context>
chip_gen: v7x
topology: tpu7x:2x2x1
jax: 0.10.0
libtpu: 0.0.40
codegen_flags: <defaults>
</compile_context>

<pallas_src>
import functools

import jax
import jax.numpy as jnp
from jax.experimental import pallas as pl
from jax.experimental.pallas import tpu as pltpu

LANE = 128   # TPU lane width
SUB = 16     # bf16 sublane packing (16 rows per vreg)


def _round_up(x, m):
    return ((x + m - 1) // m) * m


# ----------------------------------------------------------------------------
# Pallas kernel: whole MLP fused. Grid iterates over batch tiles; the weight /
# bias slabs are grid-invariant (constant index_map) and stay resident in VMEM.
# ----------------------------------------------------------------------------
def _dsnn_kernel(plan, out_f, x_ref, w_ref, b_ref, o_ref):
    """plan: static tuple over layers of (in_chunk_widths, out_chunks) where
    out_chunks = ((bias_row, (w_row_offset per in_chunk, ...)), ...).

    x_ref: f32 [bt, in_f] (unpadded).  w_ref: bf16 [rows, 128] slab.
    b_ref: f32 [n_bias_rows, 128].     o_ref: f32 [bt, out_f] (unpadded)."""
    n_layers = len(plan)
    # Cast raw f32 features to bf16 in-kernel (removes an XLA pre-pass and
    # halves the input DMA bytes).
    h_chunks = [x_ref[...].astype(jnp.bfloat16)]
    for li, (in_widths, out_chunks) in enumerate(plan):
        last = li == n_layers - 1
        z_chunks = []
        for bias_row, row_offs in out_chunks:
            acc = None
            for k, r0, hc in zip(in_widths, row_offs, h_chunks):
                w = w_ref[r0:r0 + k, :]  # static, 128-lane-dense slab slice (bf16)
                d = jnp.dot(hc, w, preferred_element_type=jnp.float32)
                acc = d if acc is None else acc + d
            z = acc + b_ref[bias_row:bias_row + 1, :]   # f32 bias add
            if last:
                z_chunks.append(z)                       # final layer: keep f32
            else:
                # dropout(p=0.0) is the identity -> omitted.
                # ReLU in bf16 (== f32 ReLU then cast); cheaper VPU on v6e/v7x.
                z_chunks.append(jnp.maximum(z.astype(jnp.bfloat16), 0))
        h_chunks = z_chunks
    # Store only the real output columns (out_f equals o_ref's full last dim).
    col = 0
    for z in h_chunks:
        n = min(LANE, out_f - col)
        o_ref[:, col:col + n] = z[:, :n].astype(o_ref.dtype)
        col += n


# ----------------------------------------------------------------------------
# Parameter packing: split every weight into 128-lane-wide column blocks (and
# 128-row-deep input blocks), zero-pad, and stack them by rows into ONE bf16
# slab of uniform width 128; biases go into one f32 [n,128] slab.
# ----------------------------------------------------------------------------
def pack_dsnn_params(params):
    in_f = params[0][0].shape[0]
    out_f = params[-1][0].shape[1]

    plan = []
    w_blocks = []            # (row_offset, f32 block of shape (rows, 128))
    b_rows = []              # f32 vectors of shape (128,)
    row = 0

    prev_widths = (in_f,)    # activation-chunk widths feeding layer 0
    for (w, b) in params:
        fi, fo = w.shape
        b = jnp.reshape(b, (-1,))
        n_oc = _round_up(fo, LANE) // LANE
        out_chunks = []
        for oc in range(n_oc):
            c0, c1 = oc * LANE, min((oc + 1) * LANE, fo)
            offs = []
            r0 = 0
            for k in prev_widths:
                blk = jnp.zeros((k, LANE), jnp.float32)
                r_real = max(0, min(k, fi - r0))
                if r_real > 0:
                    blk = blk.at[:r_real, :c1 - c0].set(w[r0:r0 + r_real, c0:c1])
                w_blocks.append((row, blk))
                offs.append(row)
                row += _round_up(k, SUB)   # keep every slab segment sublane-aligned
                r0 += k
            bias = jnp.zeros((LANE,), jnp.float32).at[:c1 - c0].set(b[c0:c1])
            out_chunks.append((len(b_rows), tuple(offs)))
            b_rows.append(bias)
        plan.append((tuple(prev_widths), tuple(out_chunks)))
        prev_widths = (LANE,) * n_oc     # next layer consumes 128-wide chunks

    w_slab = jnp.zeros((_round_up(row, SUB), LANE), jnp.bfloat16)
    for r0, blk in w_blocks:
        w_slab = w_slab.at[r0:r0 + blk.shape[0], :].set(blk.astype(jnp.bfloat16))
    b_slab = jnp.zeros((_round_up(len(b_rows), 8), LANE), jnp.float32)
    for i, v in enumerate(b_rows):
        b_slab = b_slab.at[i, :].set(v)
    return w_slab, b_slab, tuple(plan), in_f, out_f


def dsnn_forward(features, packed, *, batch_tile=1024):
    """features: [B, in_features] float32. packed: output of pack_dsnn_params."""
    w_slab, b_slab, plan, in_f, out_f = packed
    B, f = features.shape
    assert f == in_f, (f, in_f)

    # Batch tile: multiple of 16 (bf16 sublane packing). Cap so there are at
    # least two grid steps whenever possible so the "parallel" batch axis can
    # shard across both TensorCores on v7x.
    bt = _round_up(max(batch_tile, SUB), SUB)
    if B <= 2 * bt:
        bt = _round_up(pl.cdiv(B, 2), SUB)
    bt = max(SUB, min(bt, _round_up(B, SUB)))
    grid = (pl.cdiv(B, bt),)

    kernel = functools.partial(_dsnn_kernel, plan, out_f)
    return pl.pallas_call(
        kernel,
        out_shape=jax.ShapeDtypeStruct((B, out_f), jnp.float32),
        grid_spec=pltpu.PrefetchScalarGridSpec(
            num_scalar_prefetch=0,
            grid=grid,
            in_specs=[
                # Raw f32 feature tile; last dim equals the full array dim, so a
                # non-128-multiple width is legal. Cast to bf16 inside the kernel.
                pl.BlockSpec((bt, in_f), lambda i: (i, 0)),
                # Grid-invariant resident weight / bias slabs (constant index_map
                # -> DMA'd once, reused by every batch tile).
                pl.BlockSpec(w_slab.shape, lambda i: (0, 0)),
                pl.BlockSpec(b_slab.shape, lambda i: (0, 0)),
            ],
            # Narrow (unpadded) output block: contiguous rows in HBM, ~32x fewer
            # output bytes than a 128-lane padded f32 block; no wrapper slice.
            out_specs=pl.BlockSpec((bt, out_f), lambda i: (i, 0)),
        ),
        compiler_params=pltpu.CompilerParams(
            dimension_semantics=("parallel",),   # shard batch tiles across TCs (v7x)
            vmem_limit_bytes=32 * 1024 * 1024,
        ),
    )(features, w_slab, b_slab)


# ----------------------------------------------------------------------------
# Deterministic parameter construction (matches torch.nn.Linear init ranges:
# U(-1/sqrt(fan_in), +1/sqrt(fan_in)) for both weight and bias).
# ----------------------------------------------------------------------------
def make_dsnn_params(key, in_features, out_features, hidden_size=256, layers=5):
    dims = []
    h = hidden_size
    for i in range(layers):
        if i == 0:
            dims.append((in_features, h))
        if i < layers - 1:
            dims.append((h, h // 2))
            h = h // 2
        else:
            dims.append((h, out_features))

    params = []
    for (fi, fo) in dims:
        key, kw, kb = jax.random.split(key, 3)
        bound = 1.0 / jnp.sqrt(jnp.float32(fi))
        w = jax.random.uniform(kw, (fi, fo), jnp.float32, -bound, bound)
        b = jax.random.uniform(kb, (1, fo), jnp.float32, -bound, bound)
        params.append((w, b))
    return params


def dsnn_reference(features, params):
    h = features
    for li, (w, b) in enumerate(params):
        h = h @ w + b
        if li < len(params) - 1:
            h = jnp.maximum(h, 0.0)
    return h


if __name__ == "__main__":
    key = jax.random.PRNGKey(0)
    in_features, out_features = 32, 4
    kx, kp = jax.random.split(key)

    params = make_dsnn_params(kp, in_features, out_features, hidden_size=256, layers=5)
    packed = pack_dsnn_params(params)

    fwd = jax.jit(lambda x: dsnn_forward(x, packed))

    # batch=64 -> two full 32-row tiles; batch=50 -> ragged final tile (masked rows).
    for batch in (64, 50):
        x = jax.random.normal(jax.random.fold_in(kx, batch),
                              (batch, in_features), jnp.float32)
        out = jax.block_until_ready(fwd(x))
        ref = dsnn_reference(x, params)
        assert out.shape == (batch, out_features)
        err = float(jnp.max(jnp.abs(out - ref)))
        # bf16 MXU inputs with f32 accumulation -> slightly looser tolerance vs f32 ref.
        assert jnp.allclose(out, ref, atol=2e-2, rtol=2e-2), err

    print("KERNEL_OK")
</pallas_src>

<mosaic_0001>
module attributes {stable_mosaic.version = 11 : i64} {
  func.func @_dsnn_kernel(%arg0: i32, %arg1: memref<32x32xf32, #tpu.memory_space<vmem>>, %arg2: memref<832x128xbf16, #tpu.memory_space<vmem>>, %arg3: memref<8x128xf32, #tpu.memory_space<vmem>>, %arg4: memref<32x4xf32, #tpu.memory_space<vmem>>) attributes {dimension_semantics = [#tpu.dimension_semantics<parallel>], iteration_bounds = array<i64: 2>, scalar_prefetch = 0 : i64, scratch_operands = 0 : i64, tpu.core_type = #tpu.core_type<tc>, window_params = [{transform_indices = @transform_0, window_bounds = array<i64: 32, 32>}, {pipeline_mode = #tpu.pipeline_mode<synchronous>, transform_indices = @transform_1, window_bounds = array<i64: 832, 128>}, {pipeline_mode = #tpu.pipeline_mode<synchronous>, transform_indices = @transform_2, window_bounds = array<i64: 8, 128>}, {transform_indices = @transform_3, window_bounds = array<i64: 32, 4>}]} {
    %c0 = arith.constant 0 : index
    %c0_0 = arith.constant 0 : index
    %0 = vector.load %arg1[%c0, %c0_0] : memref<32x32xf32, #tpu.memory_space<vmem>>, vector<32x32xf32>
    %1 = arith.truncf %0 : vector<32x32xf32> to vector<32x32xbf16>
    %c0_1 = arith.constant 0 : index
    %c0_2 = arith.constant 0 : index
    %2 = vector.load %arg2[%c0_1, %c0_2] : memref<832x128xbf16, #tpu.memory_space<vmem>>, vector<32x128xbf16>
    %cst = arith.constant dense<0.000000e+00> : vector<32x128xf32>
    %3 = tpu.matmul %1, %2, %cst {dimension_numbers = #tpu.dot_dimension_numbers<[1], [0], [0], [1], [0, 0, 1, 1], [], []>} : vector<32x32xbf16>, vector<32x128xbf16>, vector<32x128xf32> -> vector<32x128xf32>
    %c0_3 = arith.constant 0 : index
    %c0_4 = arith.constant 0 : index
    %4 = vector.load %arg3[%c0_3, %c0_4] : memref<8x128xf32, #tpu.memory_space<vmem>>, vector<1x128xf32>
    %5 = vector.broadcast %4 : vector<1x128xf32> to vector<32x128xf32>
    %6 = arith.addf %3, %5 : vector<32x128xf32>
    %7 = arith.truncf %6 : vector<32x128xf32> to vector<32x128xbf16>
    %cst_5 = arith.constant 0.000000e+00 : bf16
    %8 = vector.broadcast %cst_5 : bf16 to vector<32x128xbf16>
    %9 = arith.maximumf %7, %8 : vector<32x128xbf16>
    %c32 = arith.constant 32 : index
    %c0_6 = arith.constant 0 : index
    %10 = vector.load %arg2[%c32, %c0_6] : memref<832x128xbf16, #tpu.memory_space<vmem>>, vector<32x128xbf16>
    %cst_7 = arith.constant dense<0.000000e+00> : vector<32x128xf32>
    %11 = tpu.matmul %1, %10, %cst_7 {dimension_numbers = #tpu.dot_dimension_numbers<[1], [0], [0], [1], [0, 0, 1, 1], [], []>} : vector<32x32xbf16>, vector<32x128xbf16>, vector<32x128xf32> -> vector<32x128xf32>
    %c1 = arith.constant 1 : index
    %c0_8 = arith.constant 0 : index
    %12 = vector.load %arg3[%c1, %c0_8] : memref<8x128xf32, #tpu.memory_space<vmem>>, vector<1x128xf32>
    %13 = vector.broadcast %12 : vector<1x128xf32> to vector<32x128xf32>
    %14 = arith.addf %11, %13 : vector<32x128xf32>
    %15 = arith.truncf %14 : vector<32x128xf32> to vector<32x128xbf16>
    %cst_9 = arith.constant 0.000000e+00 : bf16
    %16 = vector.broadcast %cst_9 : bf16 to vector<32x128xbf16>
    %17 = arith.maximumf %15, %16 : vector<32x128xbf16>
    %c64 = arith.constant 64 : index
    %c0_10 = arith.constant 0 : index
    %18 = vector.load %arg2[%c64, %c0_10] : memref<832x128xbf16, #tpu.memory_space<vmem>>, vector<128x128xbf16>
    %cst_11 = arith.constant dense<0.000000e+00> : vector<32x128xf32>
    %19 = tpu.matmul %9, %18, %cst_11 {dimension_numbers = #tpu.dot_dimension_numbers<[1], [0], [0], [1], [0, 0, 1, 1], [], []>} : vector<32x128xbf16>, vector<128x128xbf16>, vector<32x128xf32> -> vector<32x128xf32>
    %c192 = arith.constant 192 : index
    %c0_12 = arith.constant 0 : index
    %20 = vector.load %arg2[%c192, %c0_12] : memref<832x128xbf16, #tpu.memory_space<vmem>>, vector<128x128xbf16>
    %cst_13 = arith.constant dense<0.000000e+00> : vector<32x128xf32>
    %21 = tpu.matmul %17, %20, %cst_13 {dimension_numbers = #tpu.dot_dimension_numbers<[1], [0], [0], [1], [0, 0, 1, 1], [], []>} : vector<32x128xbf16>, vector<128x128xbf16>, vector<32x128xf32> -> vector<32x128xf32>
    %22 = arith.addf %19, %21 : vector<32x128xf32>
    %c2 = arith.constant 2 : index
    %c0_14 = arith.constant 0 : index
    %23 = vector.load %arg3[%c2, %c0_14] : memref<8x128xf32, #tpu.memory_space<vmem>>, vector<1x128xf32>
    %24 = vector.broadcast %23 : vector<1x128xf32> to vector<32x128xf32>
    %25 = arith.addf %22, %24 : vector<32x128xf32>
    %26 = arith.truncf %25 : vector<32x128xf32> to vector<32x128xbf16>
    %cst_15 = arith.constant 0.000000e+00 : bf16
    %27 = vector.broadcast %cst_15 : bf16 to vector<32x128xbf16>
    %28 = arith.maximumf %26, %27 : vector<32x128xbf16>
    %c320 = arith.constant 320 : index
    %c0_16 = arith.constant 0 : index
    %29 = vector.load %arg2[%c320, %c0_16] : memref<832x128xbf16, #tpu.memory_space<vmem>>, vector<128x128xbf16>
    %cst_17 = arith.constant dense<0.000000e+00> : vector<32x128xf32>
    %30 = tpu.matmul %28, %29, %cst_17 {dimension_numbers = #tpu.dot_dimension_numbers<[1], [0], [0], [1], [0, 0, 1, 1], [], []>} : vector<32x128xbf16>, vector<128x128xbf16>, vector<32x128xf32> -> vector<32x128xf32>
    %c3 = arith.constant 3 : index
    %c0_18 = arith.constant 0 : index
    %31 = vector.load %arg3[%c3, %c0_18] : memref<8x128xf32, #tpu.memory_space<vmem>>, vector<1x128xf32>
    %32 = vector.broadcast %31 : vector<1x128xf32> to vector<32x128xf32>
    %33 = arith.addf %30, %32 : vector<32x128xf32>
    %34 = arith.truncf %33 : vector<32x128xf32> to vector<32x128xbf16>
    %cst_19 = arith.constant 0.000000e+00 : bf16
    %35 = vector.broadcast %cst_19 : bf16 to vector<32x128xbf16>
    %36 = arith.maximumf %34, %35 : vector<32x128xbf16>
    %c448 = arith.constant 448 : index
    %c0_20 = arith.constant 0 : index
    %37 = vector.load %arg2[%c448, %c0_20] : memref<832x128xbf16, #tpu.memory_space<vmem>>, vector<128x128xbf16>
    %cst_21 = arith.constant dense<0.000000e+00> : vector<32x128xf32>
    %38 = tpu.matmul %36, %37, %cst_21 {dimension_numbers = #tpu.dot_dimension_numbers<[1], [0], [0], [1], [0, 0, 1, 1], [], []>} : vector<32x128xbf16>, vector<128x128xbf16>, vector<32x128xf32> -> vector<32x128xf32>
    %c4 = arith.constant 4 : index
    %c0_22 = arith.constant 0 : index
    %39 = vector.load %arg3[%c4, %c0_22] : memref<8x128xf32, #tpu.memory_space<vmem>>, vector<1x128xf32>
    %40 = vector.broadcast %39 : vector<1x128xf32> to vector<32x128xf32>
    %41 = arith.addf %38, %40 : vector<32x128xf32>
    %42 = arith.truncf %41 : vector<32x128xf32> to vector<32x128xbf16>
    %cst_23 = arith.constant 0.000000e+00 : bf16
    %43 = vector.broadcast %cst_23 : bf16 to vector<32x128xbf16>
    %44 = arith.maximumf %42, %43 : vector<32x128xbf16>
    %c576 = arith.constant 576 : index
    %c0_24 = arith.constant 0 : index
    %45 = vector.load %arg2[%c576, %c0_24] : memref<832x128xbf16, #tpu.memory_space<vmem>>, vector<128x128xbf16>
    %cst_25 = arith.constant dense<0.000000e+00> : vector<32x128xf32>
    %46 = tpu.matmul %44, %45, %cst_25 {dimension_numbers = #tpu.dot_dimension_numbers<[1], [0], [0], [1], [0, 0, 1, 1], [], []>} : vector<32x128xbf16>, vector<128x128xbf16>, vector<32x128xf32> -> vector<32x128xf32>
    %c5 = arith.constant 5 : index
    %c0_26 = arith.constant 0 : index
    %47 = vector.load %arg3[%c5, %c0_26] : memref<8x128xf32, #tpu.memory_space<vmem>>, vector<1x128xf32>
    %48 = vector.broadcast %47 : vector<1x128xf32> to vector<32x128xf32>
    %49 = arith.addf %46, %48 : vector<32x128xf32>
    %50 = arith.truncf %49 : vector<32x128xf32> to vector<32x128xbf16>
    %cst_27 = arith.constant 0.000000e+00 : bf16
    %51 = vector.broadcast %cst_27 : bf16 to vector<32x128xbf16>
    %52 = arith.maximumf %50, %51 : vector<32x128xbf16>
    %c704 = arith.constant 704 : index
    %c0_28 = arith.constant 0 : index
    %53 = vector.load %arg2[%c704, %c0_28] : memref<832x128xbf16, #tpu.memory_space<vmem>>, vector<128x128xbf16>
    %cst_29 = arith.constant dense<0.000000e+00> : vector<32x128xf32>
    %54 = tpu.matmul %52, %53, %cst_29 {dimension_numbers = #tpu.dot_dimension_numbers<[1], [0], [0], [1], [0, 0, 1, 1], [], []>} : vector<32x128xbf16>, vector<128x128xbf16>, vector<32x128xf32> -> vector<32x128xf32>
    %c6 = arith.constant 6 : index
    %c0_30 = arith.constant 0 : index
    %55 = vector.load %arg3[%c6, %c0_30] : memref<8x128xf32, #tpu.memory_space<vmem>>, vector<1x128xf32>
    %56 = vector.broadcast %55 : vector<1x128xf32> to vector<32x128xf32>
    %57 = arith.addf %54, %56 : vector<32x128xf32>
    %58 = vector.extract_strided_slice %57 {offsets = [0, 0], sizes = [32, 4], strides = [1, 1]} : vector<32x128xf32> to vector<32x4xf32>
    %c0_31 = arith.constant 0 : index
    %c0_32 = arith.constant 0 : index
    %59 = vector.load %arg4[%c0_31, %c0_32] : memref<32x4xf32, #tpu.memory_space<vmem>>, vector<32x4xf32>
    tpu.vector_store %arg4[%c0_31, %c0_32], %58 {strides = array<i32>} : memref<32x4xf32, #tpu.memory_space<vmem>>, vector<32x4xf32>,
    return
  }
  func.func @transform_0(%arg0: i32) -> (i32, i32) {
    %c0_i32 = arith.constant 0 : i32
    %c0_i32_0 = arith.constant 0 : i32
    return %arg0, %c0_i32 : i32, i32
  }
  func.func @transform_1(%arg0: i32) -> (i32, i32) {
    %c0_i32 = arith.constant 0 : i32
    %c0_i32_0 = arith.constant 0 : i32
    %c0_i32_1 = arith.constant 0 : i32
    return %c0_i32, %c0_i32_0 : i32, i32
  }
  func.func @transform_2(%arg0: i32) -> (i32, i32) {
    %c0_i32 = arith.constant 0 : i32
    %c0_i32_0 = arith.constant 0 : i32
    %c0_i32_1 = arith.constant 0 : i32
    return %c0_i32, %c0_i32_0 : i32, i32
  }
  func.func @transform_3(%arg0: i32) -> (i32, i32) {
    %c0_i32 = arith.constant 0 : i32
    %c0_i32_0 = arith.constant 0 : i32
    return %arg0, %c0_i32 : i32, i32
  }
}

</mosaic_0001>

<bundles_post_ra>
// kernel: _lambda_.1
= control target key start
LH: loop header
LB: loop body
LE: loop exit
PB: predicated region body
PF: predicated region fallthrough
CT: control target
= control target key end

     0   :  { %8 = vsyncpa [#allocation3], 0  ;;  %s1569_s12 = smov 0   ;;  %s1672_s0 = inlined_call_operand.vmem [shape: f32[64,32], index: 0, kind: input, shape index: {}]   ;;  %s1673_s1 = inlined_call_operand.hbm [shape: bf16[832,128], index: 1, kind: input, shape index: {}]   ;;  %s1674_s2 = inlined_call_operand.vmem [shape: f32[8,128], index: 2, kind: input, shape index: {}]   ;;  %s1675_s3 = inlined_call_operand.vmem [shape: f32[64,4], index: 3, kind: output, shape index: {}]  }
   0x1 LB: > { %s1147_s13 = sadd.s32 4294967295, %s1543_s12   ;;  %p1149_p0 = scmp.ge.s32.totalorder %s1543_s12, 1  ;;  %s1543_s12 = sphi %s1569_s12, %s14_s12  }
   0x2   : > { %p113_p1 = scmp.lt.s32.totalorder %s1543_s12, 3  ;;  %s1545_s14 = smov [#allocation2]  }
   0x3   : > { %s125_s15 = sshll.u32 %s1545_s14, 4  ;;  %p1583_p3 = scmp.eq.s32.totalorder %s1147_s13, 0  ;;  %s126_s15 = int_to_ptr.vmem [resolvable:$true] %s125_s15 }
   0x4   : > { %p1577_p2 = pnand %p1149_p0, %p113_p1  ;;  %s1505_s21 = scalar_lea.hbm %s1673_s1, 6656 }
   0x5   : > { %s1680_s17 = scalar_select %p1583_p3, 1, 0 }
   0x6   : > { %s1679_s16 = scalar_select %p1577_p2, 1, 0 }
   0x7   : > { %p1435_p4 = pneg %p1577_p2  ;;  %p1506_p6 = scmp.ne.s32.totalorder %s1673_s1, %s1505_s21 }
   0x8   : > { %p1512_p10 = scmp.lt.u32.totalorder %s1505_s21, %s1673_s1 }
   0x9   : > { %p1591_p5 = pnand %p1583_p3, %p1435_p4 }
   0xb   : > { %p1507_p7 = pneg %p1591_p5 }
   0xd   : > { %p1508_p8 = pnand %p1507_p7, %p1506_p6 }
   0xf   : > { %p1509_p9 = pneg %p1508_p8 }
  0x11   : > { %p1514_p11 = pnand %p1512_p10, %p1509_p9 }
  0x13   : > { %1517 = shalt.err (!%p1514_p11)
}
  0x14   : > { %s1518_s26 = scalar_lea.vmem %s126_s15, 6656  ;;  %p1526_p1 = scmp.lt.s32.totalorder %s126_s15, %s126_s15 }
  0x15   : > { %p1519_p12 = scmp.ne.s32.totalorder %s126_s15, %s1518_s26  ;;  %p1527_p4 = scmp.lt.s32.totalorder %s1518_s26, %s1518_s26 }
  0x17   : > { %p1521_p13 = pnand %p1519_p12, %p1507_p7  ;;  %p1528_p3 = por %p1527_p4, %p1526_p1 }
  0x19   : > { %p1522_p0 = pneg %p1521_p13 }
  0x1b   : > { %p1529_p2 = pnand %p1528_p3, %p1522_p0 }
  0x1d   : > { %1532 = shalt.err (!%p1529_p2)
}
  0x1e   : > { %s1546_s27 = smov 64   ;;  %s1547_s28 = smov 4  }
  0x1f   : > { %1438 = dma.hbm_to_vmem [thread:$0]  (!%p1591_p5), %s1673_s1, 6656, %s126_s15, [#allocation3], %s1546_s27, %s1546_s27, %s1547_s28  }
  0x20   : > { %p1682_p6 = scmp.ne.s32.totalorder %s1679_s16, 0 }
  0x21   : > { %p1683_p8 = scmp.ne.s32.totalorder (!%p1682_p6), %s1680_s17, 0 }
  0x22   : > { %153 = sbr.rel (%p1682_p6) target bundleno = 1412 (0x584), region = 32 }
  0x29   : > { %1538 = dma.done.wait (%p1683_p8), [#allocation3], 6656  }
  0x2a   : > { %1540 = vsyncadd (%p1683_p8), [#allocation3], 4294960640  ;;  %s1154_s4 = sshll.u32 %s1147_s13, 2  ;;  %v1453_v0 = vld [vmem:[#allocation2 + $0x10] sm:$0xff]   ;;  %v1454_v1 = vld [vmem:[#allocation2 + $0x18] sm:$0xff]   ;;  %vm217_vm0 = vcmask 261120  }
  0x2b   : > { %p178_p2 = scmp.lt.s32.totalorder %s1154_s4, 7  ;;  %1299 = vmatprep.subr.bf16.mxu1 %v1453_v0  ;;  %v1455_v7 = vld [vmem:[#allocation2] sm:$0xff]   ;;  %v1456_v8 = vld [vmem:[#allocation2 + $0x8] sm:$0xff]   ;;  %v1459_v12 = vld [vmem:[#allocation2 + $0x70] sm:$0xff]   ;;  %v1548_v44 = vmov 0   ;;  %vm1074_vm1 = vcmask 31744  }
  0x2c   : > { %1300 = vmatpush3.bf16.msra.mxu1 %v1453_v0  ;;  %1291 = vmatprep.subr.bf16.mxu0 %v1455_v7  ;;  %v1457_v10 = vld [vmem:[#allocation2 + $0x60] sm:$0xff]   ;;  %v1458_v11 = vld [vmem:[#allocation2 + $0x68] sm:$0xff]   ;;  %v1460_v13 = vld [vmem:[#allocation2 + $0x78] sm:$0xff]  }
  0x2d   : > { %s1685_s4 = smov (!%p178_p2, %s1154_s4), 7  ;;  %1301 = vmatprep.subr.bf16.mxu1 %v1454_v1  ;;  %1292 = vmatpush3.bf16.msra.mxu0 %v1455_v7  ;;  %v1461_v14 = vld [vmem:[#allocation2 + $0x80] sm:$0xff]   ;;  %v1462_v15 = vld [vmem:[#allocation2 + $0x88] sm:$0xff]   ;;  %v1463_v16 = vld [vmem:[#allocation2 + $0x90] sm:$0xff]  }
  0x2e   : > { %s1155_s5 = sshll.u32 %s1685_s4, 3  ;;  %1293 = vmatprep.subr.bf16.mxu0 %v1456_v8  ;;  %v1464_v17 = vld [vmem:[#allocation2 + $0x98] sm:$0xff]   ;;  %v1465_v18 = vld [vmem:[#allocation2 + $0x20] sm:$0xff]   ;;  %v1474_v20 = vld [vmem:[#allocation2 + $0xa8] sm:$0xff]  }
  0x2f   : > { %s181_s8 = scalar_lea.vmem %s1672_s0, %s1155_s5  ;;  %v1473_v19 = vld [vmem:[#allocation2 + $0xa0] sm:$0xff]   ;;  %v1475_v21 = vld [vmem:[#allocation2 + $0xb0] sm:$0xff]   ;;  %v1476_v22 = vld [vmem:[#allocation2 + $0xb8] sm:$0xff]   ;;  %s187_s26 = scalar_lea.vmem %s1675_s3, %s1155_s5 }
  0x30   : > { %v190_v2 = vld [vmem:[%s181_s8] sm:$0xff]  ;;  %v191_v3 = vld [vmem:[%s181_s8 + $0x8] sm:$0xff]  ;;  %v192_v4 = vld [vmem:[%s181_s8 + $0x10] sm:$0xff]  ;;  %1302 = vmatpush3.bf16.msra.mxu1 %v1454_v1 }
  0x31   : > { %v194_v5 = vpack.c.bf16 %v191_v3, %v190_v2  ;;  %v193_v6 = vld [vmem:[%s181_s8 + $0x18] sm:$0xff]  ;;  %1294 = vmatpush3.bf16.msra.mxu0 %v1456_v8  ;;  %1347 = vmatprep.subr.bf16.mxu1 %v1473_v19  ;;  %v1477_v23 = vld [vmem:[#allocation2 + $0xc0] sm:$0xff]   ;;  %v1478_v24 = vld [vmem:[#allocation2 + $0xc8] sm:$0xff]  }
  0x32   : > { %v195_v9 = vpack.c.bf16 %v193_v6, %v192_v4  ;;  %1307 = vmatprep.subr.bf16.mxu0 %v1457_v10  ;;  %v1163_v26 = vld [vmem:[%s1674_s2 + $0x1] ss:$0 sm:$0xff]  ;;  %v1158_v29 = vld [vmem:[%s1674_s2] ss:$0 sm:$0xff]  ;;  %v1466_v48 = vld [vmem:[#allocation2 + $0x28] sm:$0xff]  }
  0x33   : > { %1303 = vmatprep.mubr.msk.bf16.mxu1 %vm217_vm0, %v194_v5  ;;  %1295 = vmatprep.mubr.msk.bf16.mxu0 %vm217_vm0, %v194_v5  ;;  %v1467_v52 = vld [vmem:[#allocation2 + $0x30] sm:$0xff]   ;;  %v1468_v53 = vld [vmem:[#allocation2 + $0x38] sm:$0xff]   ;;  %v1469_v54 = vld [vmem:[#allocation2 + $0x40] sm:$0xff]  }
  0x34   : > { %1304 = vmatmul.mubr.msk.bf16.vlgmr.msra.gmra.mrb[0].mxu1 %vm217_vm0, %v195_v9  ;;  %1296 = vmatmul.mubr.msk.bf16.vlgmr.msra.gmra.mrb[0].mxu0 %vm217_vm0, %v195_v9  ;;  %v1470_v55 = vld [vmem:[#allocation2 + $0x48] sm:$0xff]   ;;  %v1471_v56 = vld [vmem:[#allocation2 + $0x50] sm:$0xff]   ;;  %v1472_v57 = vld [vmem:[#allocation2 + $0x58] sm:$0xff]  }
  0x35   : > { %1308 = vmatpush3.bf16.msra.mxu0 %v1457_v10  ;;  %1348 = vmatpush3.bf16.msra.mxu1 %v1473_v19  ;;  %v1479_v59 = vld [vmem:[#allocation2 + $0xd0] sm:$0xff]   ;;  %v1480_v60 = vld [vmem:[#allocation2 + $0xd8] sm:$0xff]   ;;  %v1481_v61 = vld [vmem:[#allocation2 + $0xe0] sm:$0xff]  }
  0x36   : > { %1309 = vmatprep.subr.bf16.mxu0 %v1458_v11  ;;  %1349 = vmatprep.subr.bf16.mxu1 %v1474_v20  ;;  %v1184_v63 = vld [vmem:[%s1674_s2 + $0x2] ss:$0 sm:$0xff]  ;;  %v1490_v19 = vld [vmem:[#allocation2 + $0x128] sm:$0xff]  }
  0x39   : > { %1310 = vmatpush3.bf16.msra.mxu0 %v1458_v11  ;;  %1350 = vmatpush3.bf16.msra.mxu1 %v1474_v20  ;;  %v1482_v11 = vld [vmem:[#allocation2 + $0xe8] sm:$0xff]   ;;  %v1491_v20 = vld [vmem:[#allocation2 + $0x130] sm:$0xff]  }
  0x3a   : > { %1311 = vmatprep.subr.bf16.mxu0 %v1459_v12  ;;  %1351 = vmatprep.subr.bf16.mxu1 %v1475_v21 }
  0x3d   : > { %1312 = vmatpush3.bf16.msra.mxu0 %v1459_v12  ;;  %1352 = vmatpush3.bf16.msra.mxu1 %v1475_v21  ;;  %v1483_v12 = vld [vmem:[#allocation2 + $0xf0] sm:$0xff]   ;;  %v1492_v21 = vld [vmem:[#allocation2 + $0x138] sm:$0xff]  }
  0x3e   : > { %1313 = vmatprep.subr.bf16.mxu0 %v1460_v13  ;;  %1353 = vmatprep.subr.bf16.mxu1 %v1476_v22 }
  0x41   : > { %1314 = vmatpush3.bf16.msra.mxu0 %v1460_v13  ;;  %1354 = vmatpush3.bf16.msra.mxu1 %v1476_v22  ;;  %v1484_v13 = vld [vmem:[#allocation2 + $0xf8] sm:$0xff]   ;;  %v1493_v22 = vld [vmem:[#allocation2 + $0x140] sm:$0xff]  }
  0x42   : > { %1315 = vmatprep.subr.bf16.mxu0 %v1461_v14  ;;  %1355 = vmatprep.subr.bf16.mxu1 %v1477_v23 }
  0x45   : > { %1316 = vmatpush3.bf16.msra.mxu0 %v1461_v14  ;;  %1356 = vmatpush3.bf16.msra.mxu1 %v1477_v23  ;;  %v1485_v14 = vld [vmem:[#allocation2 + $0x100] sm:$0xff]   ;;  %v1494_v23 = vld [vmem:[#allocation2 + $0x148] sm:$0xff]  }
  0x46   : > { %1317 = vmatprep.subr.bf16.mxu0 %v1462_v15  ;;  %1357 = vmatprep.subr.bf16.mxu1 %v1478_v24 }
  0x49   : > { %1318 = vmatpush3.bf16.msra.mxu0 %v1462_v15  ;;  %1358 = vmatpush3.bf16.msra.mxu1 %v1478_v24  ;;  %v1486_v15 = vld [vmem:[#allocation2 + $0x108] sm:$0xff]  }
  0x4a   : > { %1319 = vmatprep.subr.bf16.mxu0 %v1463_v16  ;;  %1359 = vmatprep.subr.bf16.mxu1 %v1479_v59 }
  0x4d   : > { %1320 = vmatpush3.bf16.msra.mxu0 %v1463_v16  ;;  %1360 = vmatpush3.bf16.msra.mxu1 %v1479_v59  ;;  %v1487_v16 = vld [vmem:[#allocation2 + $0x110] sm:$0xff]  }
  0x4e   : > { %1321 = vmatprep.subr.bf16.mxu0 %v1464_v17  ;;  %1361 = vmatprep.subr.bf16.mxu1 %v1480_v60  ;;  %v1503_v59 = vld [vmem:[#allocation2 + $0x190] sm:$0xff]  }
  0x51   : > { %1322 = vmatpush3.bf16.msra.mxu0 %v1464_v17  ;;  %1362 = vmatpush3.bf16.msra.mxu1 %v1480_v60  ;;  %v1488_v17 = vld [vmem:[#allocation2 + $0x118] sm:$0xff]  }
  0x52   : > { %1327 = vmatprep.subr.bf16.mxu0 %v1465_v18  ;;  %1367 = vmatprep.subr.bf16.mxu1 %v1481_v61  ;;  %v1504_v60 = vld [vmem:[#allocation2 + $0x198] sm:$0xff]  }
 0x107   : > { %v1305_v25 = vpop.f32.mrb[0].mxu1  ;;  %v1297_v35 = vpop.f32.mrb[0].mxu0 }
 0x108   : > { %v332_v27 = vpop.f32.mrb[1].mxu1  ;;  %v341_v30 = vadd.f32 %v1305_v25, %v1163_v26  ;;  %v267_v37 = vadd.f32 %v1297_v35, %v1158_v29  ;;  %v258_v38 = vpop.f32.mrb[1].mxu0  ;;  %v1185_v25 = vld [vmem:[%s1674_s2 + $0x3] ss:$0 sm:$0xff] }
 0x109   : > { %v1306_v28 = vpop.f32.mrb[2].mxu1  ;;  %v333_v33 = vadd.f32 %v1163_v26, %v332_v27  ;;  %v259_v40 = vadd.f32 %v1158_v29, %v258_v38  ;;  %v1298_v41 = vpop.f32.mrb[2].mxu0  ;;  %v1496_v38 = vld [vmem:[#allocation2 + $0x158] sm:$0xff]  }
 0x10a   : > { %v344_v31 = vadd.f32 %v1306_v28, %v1163_v26  ;;  %v335_v32 = vpop.f32.mrb[3].mxu1  ;;  %v270_v42 = vadd.f32 %v1298_v41, %v1158_v29  ;;  %v261_v43 = vpop.f32.mrb[3].mxu0  ;;  %v1499_v41 = vld [vmem:[#allocation2 + $0x170] sm:$0xff]  }
 0x10b   : > { %v336_v34 = vadd.f32 %v1163_v26, %v335_v32  ;;  %v262_v46 = vadd.f32 %v1158_v29, %v261_v43  ;;  %v1501_v43 = vld [vmem:[#allocation2 + $0x180] sm:$0xff]  }
 0x10c   : > { %v348_v36 = vpack.c.bf16 %v344_v31, %v341_v30  ;;  %v274_v49 = vpack.c.bf16 %v270_v42, %v267_v37  ;;  %v1495_v37 = vld [vmem:[#allocation2 + $0x150] sm:$0xff]   ;;  %v1500_v42 = vld [vmem:[#allocation2 + $0x178] sm:$0xff]  }
 0x10d   : > { %v347_v39 = vpack.c.bf16 %v336_v34, %v333_v33  ;;  %v273_v50 = vpack.c.bf16 %v262_v46, %v259_v40  ;;  %v1498_v40 = vld [vmem:[#allocation2 + $0x168] sm:$0xff]  }
 0x10e   : > { %v350_v47 = vmax.bf16 %v1548_v44, %v348_v36  ;;  %v276_v58 = vmax.bf16 %v1548_v44, %v274_v49 }
 0x10f   : > { %v349_v45 = vmax.bf16 %v1548_v44, %v347_v39  ;;  %v275_v51 = vmax.bf16 %v1548_v44, %v273_v50  ;;  %v1497_v39 = vld [vmem:[#allocation2 + $0x160] sm:$0xff]  }
 0x111   : > { %1323 = vmatprep.mubr.bf16.mxu0 %v349_v45  ;;  %v1502_v45 = vld [vmem:[#allocation2 + $0x188] sm:$0xff]  }
 0x112   : > { %1324 = vmatmul.mubr.bf16.vlgmr.msra.gmra.mrb[4].mxu0 %v350_v47  ;;  %v1194_v47 = vld [vmem:[%s1674_s2 + $0x4] ss:$0 sm:$0xff] }
 0x113   : > { %1328 = vmatpush3.bf16.msra.mxu0 %v1465_v18  ;;  %1343 = vmatprep.mubr.bf16.mxu0 %v275_v51  ;;  %v1489_v18 = vld [vmem:[#allocation2 + $0x120] sm:$0xff]  }
 0x114   : > { %1329 = vmatprep.subr.bf16.mxu0 %v1466_v48 }
 0x117   : > { %1330 = vmatpush3.bf16.msra.mxu0 %v1466_v48 }
 0x118   : > { %1331 = vmatprep.subr.bf16.mxu0 %v1467_v52 }
 0x11b   : > { %1332 = vmatpush3.bf16.msra.mxu0 %v1467_v52 }
 0x11c   : > { %1333 = vmatprep.subr.bf16.mxu0 %v1468_v53 }
 0x11f   : > { %1334 = vmatpush3.bf16.msra.mxu0 %v1468_v53 }
 0x120   : > { %1335 = vmatprep.subr.bf16.mxu0 %v1469_v54 }
 0x123   : > { %1336 = vmatpush3.bf16.msra.mxu0 %v1469_v54 }
 0x124   : > { %1337 = vmatprep.subr.bf16.mxu0 %v1470_v55 }
 0x127   : > { %1338 = vmatpush3.bf16.msra.mxu0 %v1470_v55 }
 0x128   : > { %1339 = vmatprep.subr.bf16.mxu0 %v1471_v56 }
 0x12b   : > { %1340 = vmatpush3.bf16.msra.mxu0 %v1471_v56 }
 0x12c   : > { %1341 = vmatprep.subr.bf16.mxu0 %v1472_v57 }
 0x12f   : > { %1342 = vmatpush3.bf16.msra.mxu0 %v1472_v57 }
 0x130   : > { %1387 = vmatprep.subr.bf16.mxu0 %v1489_v18 }
 0x132   : > { %1344 = vmatmul.mubr.bf16.vlgmr.msra.gmra.mrb[4].mxu0 %v276_v58 }
 0x133   : > { %1388 = vmatpush3.bf16.msra.mxu0 %v1489_v18 }
 0x134   : > { %1389 = vmatprep.subr.bf16.mxu0 %v1490_v19 }
 0x137   : > { %1390 = vmatpush3.bf16.msra.mxu0 %v1490_v19 }
 0x138   : > { %1391 = vmatprep.subr.bf16.mxu0 %v1491_v20 }
 0x13b   : > { %1392 = vmatpush3.bf16.msra.mxu0 %v1491_v20 }
 0x13c   : > { %1393 = vmatprep.subr.bf16.mxu0 %v1492_v21 }
 0x13f   : > { %1394 = vmatpush3.bf16.msra.mxu0 %v1492_v21 }
 0x140   : > { %1395 = vmatprep.subr.bf16.mxu0 %v1493_v22 }
 0x143   : > { %1396 = vmatpush3.bf16.msra.mxu0 %v1493_v22 }
 0x144   : > { %1397 = vmatprep.subr.bf16.mxu0 %v1494_v23 }
 0x147   : > { %1398 = vmatpush3.bf16.msra.mxu0 %v1494_v23 }
 0x148   : > { %1399 = vmatprep.subr.bf16.mxu0 %v1495_v37 }
 0x14b   : > { %1400 = vmatpush3.bf16.msra.mxu0 %v1495_v37 }
 0x14c   : > { %1401 = vmatprep.subr.bf16.mxu0 %v1496_v38 }
 0x14f   : > { %1402 = vmatpush3.bf16.msra.mxu0 %v1496_v38 }
 0x205   : > { %v1345_v62 = vpop.f32.mrb[4].mxu0 }
 0x206   : > { %v562_v0 = vpop.f32.mrb[5].mxu0  ;;  %v584_v2 = vadd.f32 %v1345_v62, %v1184_v63  ;;  %v1203_v62 = vld [vmem:[%s1674_s2 + $0x5] ss:$0 sm:$0xff] }
 0x207   : > { %v1346_v1 = vpop.f32.mrb[6].mxu0  ;;  %v582_v5 = vadd.f32 %v1184_v63, %v562_v0 }
 0x208   : > { %v585_v3 = vadd.f32 %v1346_v1, %v1184_v63  ;;  %v565_v4 = vpop.f32.mrb[7].mxu0 }
 0x209   : > { %v583_v6 = vadd.f32 %v1184_v63, %v565_v4 }
 0x20a   : > { %v587_v7 = vpack.c.bf16 %v585_v3, %v584_v2 }
 0x20b   : > { %v586_v8 = vpack.c.bf16 %v583_v6, %v582_v5 }
 0x20c   : > { %v589_v10 = vmax.bf16 %v1548_v44, %v587_v7 }
 0x20d   : > { %v588_v9 = vmax.bf16 %v1548_v44, %v586_v8 }
 0x20f   : > { %1363 = vmatprep.mubr.bf16.mxu1 %v588_v9 }
 0x210   : > { %1364 = vmatmul.mubr.bf16.vlgmr.msra.gmra.mrb[4].mxu1 %v589_v10  ;;  %v1212_v10 = vld [vmem:[%s1674_s2 + $0x6] ss:$0 sm:$0xff] }
 0x211   : > { %1368 = vmatpush3.bf16.msra.mxu1 %v1481_v61 }
 0x212   : > { %1369 = vmatprep.subr.bf16.mxu1 %v1482_v11 }
 0x215   : > { %1370 = vmatpush3.bf16.msra.mxu1 %v1482_v11 }
 0x216   : > { %1371 = vmatprep.subr.bf16.mxu1 %v1483_v12 }
 0x219   : > { %1372 = vmatpush3.bf16.msra.mxu1 %v1483_v12 }
 0x21a   : > { %1373 = vmatprep.subr.bf16.mxu1 %v1484_v13 }
 0x21d   : > { %1374 = vmatpush3.bf16.msra.mxu1 %v1484_v13 }
 0x21e   : > { %1375 = vmatprep.subr.bf16.mxu1 %v1485_v14 }
 0x221   : > { %1376 = vmatpush3.bf16.msra.mxu1 %v1485_v14 }
 0x222   : > { %1377 = vmatprep.subr.bf16.mxu1 %v1486_v15 }
 0x225   : > { %1378 = vmatpush3.bf16.msra.mxu1 %v1486_v15 }
 0x226   : > { %1379 = vmatprep.subr.bf16.mxu1 %v1487_v16 }
 0x229   : > { %1380 = vmatpush3.bf16.msra.mxu1 %v1487_v16 }
 0x22a   : > { %1381 = vmatprep.subr.bf16.mxu1 %v1488_v17 }
 0x22d   : > { %1382 = vmatpush3.bf16.msra.mxu1 %v1488_v17 }
 0x22e   : > { %1407 = vmatprep.subr.bf16.mxu1 %v1497_v39 }
 0x2e3   : > { %v1365_v24 = vpop.f32.mrb[4].mxu1 }
 0x2e4   : > { %v693_v26 = vpop.f32.mrb[5].mxu1  ;;  %v702_v28 = vadd.f32 %v1365_v24, %v1185_v25 }
 0x2e5   : > { %v1366_v27 = vpop.f32.mrb[6].mxu1  ;;  %v694_v31 = vadd.f32 %v1185_v25, %v693_v26 }
 0x2e6   : > { %v705_v29 = vadd.f32 %v1366_v27, %v1185_v25  ;;  %v696_v30 = vpop.f32.mrb[7].mxu1 }
 0x2e7   : > { %v697_v32 = vadd.f32 %v1185_v25, %v696_v30 }
 0x2e8   : > { %v709_v33 = vpack.c.bf16 %v705_v29, %v702_v28 }
 0x2e9   : > { %v708_v34 = vpack.c.bf16 %v697_v32, %v694_v31 }
 0x2ea   : > { %v711_v36 = vmax.bf16 %v1548_v44, %v709_v33 }
 0x2eb   : > { %v710_v35 = vmax.bf16 %v1548_v44, %v708_v34 }
 0x2ed   : > { %1383 = vmatprep.mubr.bf16.mxu1 %v710_v35 }
 0x2ee   : > { %1384 = vmatmul.mubr.bf16.vlgmr.msra.gmra.mrb[8].mxu1 %v711_v36 }
 0x2ef   : > { %1408 = vmatpush3.bf16.msra.mxu1 %v1497_v39 }
 0x2f0   : > { %1409 = vmatprep.subr.bf16.mxu1 %v1498_v40 }
 0x2f3   : > { %1410 = vmatpush3.bf16.msra.mxu1 %v1498_v40 }
 0x2f4   : > { %1411 = vmatprep.subr.bf16.mxu1 %v1499_v41 }
 0x2f7   : > { %1412 = vmatpush3.bf16.msra.mxu1 %v1499_v41 }
 0x2f8   : > { %1413 = vmatprep.subr.bf16.mxu1 %v1500_v42 }
 0x2fb   : > { %1414 = vmatpush3.bf16.msra.mxu1 %v1500_v42 }
 0x2fc   : > { %1415 = vmatprep.subr.bf16.mxu1 %v1501_v43 }
 0x2ff   : > { %1416 = vmatpush3.bf16.msra.mxu1 %v1501_v43 }
 0x300   : > { %1417 = vmatprep.subr.bf16.mxu1 %v1502_v45 }
 0x303   : > { %1418 = vmatpush3.bf16.msra.mxu1 %v1502_v45 }
 0x304   : > { %1419 = vmatprep.subr.bf16.mxu1 %v1503_v59 }
 0x307   : > { %1420 = vmatpush3.bf16.msra.mxu1 %v1503_v59 }
 0x308   : > { %1421 = vmatprep.subr.bf16.mxu1 %v1504_v60 }
 0x30b   : > { %1422 = vmatpush3.bf16.msra.mxu1 %v1504_v60 }
 0x3c1   : > { %v1385_v46 = vpop.f32.mrb[8].mxu1 }
 0x3c2   : > { %v815_v48 = vpop.f32.mrb[9].mxu1  ;;  %v824_v50 = vadd.f32 %v1385_v46, %v1194_v47 }
 0x3c3   : > { %v1386_v49 = vpop.f32.mrb[10].mxu1  ;;  %v816_v53 = vadd.f32 %v1194_v47, %v815_v48 }
 0x3c4   : > { %v827_v51 = vadd.f32 %v1386_v49, %v1194_v47  ;;  %v818_v52 = vpop.f32.mrb[11].mxu1 }
 0x3c5   : > { %v819_v54 = vadd.f32 %v1194_v47, %v818_v52 }
 0x3c6   : > { %v831_v55 = vpack.c.bf16 %v827_v51, %v824_v50 }
 0x3c7   : > { %v830_v56 = vpack.c.bf16 %v819_v54, %v816_v53 }
 0x3c8   : > { %v833_v58 = vmax.bf16 %v1548_v44, %v831_v55 }
 0x3c9   : > { %v832_v57 = vmax.bf16 %v1548_v44, %v830_v56 }
 0x3cb   : > { %1403 = vmatprep.mubr.bf16.mxu0 %v832_v57 }
 0x3cc   : > { %1404 = vmatmul.mubr.bf16.vlgmr.msra.gmra.mrb[8].mxu0 %v833_v58 }
 0x49f   : > { %v1405_v61 = vpop.f32.mrb[8].mxu0 }
 0x4a0   : > { %v937_v63 = vpop.f32.mrb[9].mxu0  ;;  %v946_v1 = vadd.f32 %v1405_v61, %v1203_v62 }
 0x4a1   : > { %v1406_v0 = vpop.f32.mrb[10].mxu0  ;;  %v938_v4 = vadd.f32 %v1203_v62, %v937_v63 }
 0x4a2   : > { %v949_v2 = vadd.f32 %v1406_v0, %v1203_v62  ;;  %v940_v3 = vpop.f32.mrb[11].mxu0 }
 0x4a3   : > { %v941_v5 = vadd.f32 %v1203_v62, %v940_v3 }
 0x4a4   : > { %v953_v6 = vpack.c.bf16 %v949_v2, %v946_v1 }
 0x4a5   : > { %v952_v7 = vpack.c.bf16 %v941_v5, %v938_v4 }
 0x4a6   : > { %v955_v9 = vmax.bf16 %v1548_v44, %v953_v6 }
 0x4a7   : > { %v954_v8 = vmax.bf16 %v1548_v44, %v952_v7 }
 0x4a9   : > { %1423 = vmatprep.mubr.bf16.mxu1 %v954_v8 }
 0x4aa   : > { %1424 = vmatmul.mubr.bf16.vlgmr.msra.gmra.mrb[12].mxu1 %v955_v9 }
 0x57d   : > { %v1425_v11 = vpop.f32.mrb[12].mxu1 }
 0x57e   : > { %v1059_v12 = vpop.f32.mrb[13].mxu1  ;;  %v1068_v44 = vadd.f32 %v1425_v11, %v1212_v10 }
 0x57f   : > { %v1060_v13 = vadd.f32 %v1212_v10, %v1059_v12  ;;  %v1426_v14 = vpop.f32.mrb[14].mxu1 }
 0x580   : > { %v1062_v15 = vpop.f32.mrb[15].mxu1  ;;  %v1071_v17 = vadd.f32 %v1426_v14, %v1212_v10  ;;  %1077 = vst.msk [vmem:[%s187_s26 + $0x10] sm:$0xff] %vm1074_vm1, %v1068_v44 }
 0x581   : > { %1075 = vst.msk [vmem:[%s187_s26] sm:$0xff] %vm1074_vm1, %v1060_v13  ;;  %v1063_v16 = vadd.f32 %v1212_v10, %v1062_v15 }
 0x582   : > { %1078 = vst.msk [vmem:[%s187_s26 + $0x18] sm:$0xff] %vm1074_vm1, %v1071_v17 }
 0x583   : > { %1076 = vst.msk [vmem:[%s187_s26 + $0x8] sm:$0xff] %vm1074_vm1, %v1063_v16 }
 0x584 PF: > { %s14_s12 = sadd.s32 1, %s1543_s12  }
 0x585   : > { %p11_p3 = scmp.ge.s32.totalorder %s14_s12, 4  }
 0x587   :  { %13 = sbr.rel (!%p11_p3) target bundleno = 1 (0x1), region = 67 }
 0x58e   :  { %1101 = vsyncpa [#allocation3], 1 }
 0x58f   :  { %1103 = vsyncpa [#allocation3 + $0x1], 1 }

</bundles_post_ra>
